<compile_context>
chip_gen: v7x
topology: tpu7x:2x2x1
jax: 0.10.0
libtpu: 0.0.40
codegen_flags: <defaults>
</compile_context>

<pallas_src>
import jax
import jax.numpy as jnp
from jax.experimental import pallas as pl
from jax.experimental.pallas import tpu as pltpu

# Full-precision f32 matmuls for both the kernel and the reference check.
jax.config.update("jax_default_matmul_precision", "highest")

NN_LAYERS = [2, 32, 32, 1]            # [in, hidden1, hidden2, out]
D_IN, H1, H2, D_OUT = NN_LAYERS

# Packed parameter slab layout (columns), rows = 32 hidden units.
# NOTE: this packing assumes H1 == H2 (true for this module config).
PACKED_COLS = 128                      # lane-aligned slab width
COL_W2 = 0                             # (H2, H1)  width H1
COL_W1 = COL_W2 + H1                   # (H1, D_IN) width D_IN
COL_B1 = COL_W1 + D_IN                 # (H1, 1)
COL_B2 = COL_B1 + 1                    # (H2, 1)
COL_W3 = COL_B2 + 1                    # (H2, 1)   == w3 (PyTorch (1,H2)) transposed

DEFAULT_B_BLK = 256                    # batch (lane) tile; multiple of 128.
# VMEM footprint per step is tiny (<1 MiB); tiles up to ~8K lanes would still
# fit comfortably within the v5e/v7x scoped-VMEM defaults.


def _round_up(n, m):
    return (n + m - 1) // m * m


def mlp_kernel(xT_ref, p_ref, oT_ref):
    xT = xT_ref[...]                                   # (D_IN, B_BLK), batch on lanes

    # Static slices of the single VMEM-resident parameter slab.
    w1 = p_ref[:, COL_W1:COL_W1 + D_IN]                # (H1, D_IN)
    b1 = p_ref[:, COL_B1:COL_B1 + 1]                   # (H1, 1)
    w2 = p_ref[:, COL_W2:COL_W2 + H1]                  # (H2, H1)
    b2 = p_ref[:, COL_B2:COL_B2 + 1]                   # (H2, 1)
    w3 = p_ref[:, COL_W3:COL_W3 + 1]                   # (H2, 1)

    # layer_1: Linear(2 -> 32) + tanh.  K = 2, so two VPU broadcast-FMAs beat a
    # padded MXU matmul; (out,1) bias column lane-broadcasts over the batch.
    h = w1[:, 0:1] * xT[0:1, :]
    for k in range(1, D_IN):
        h = h + w1[:, k:k + 1] * xT[k:k + 1, :]
    h = jnp.tanh(h + b1)                               # (H1, B_BLK)

    # layer_2: Linear(32 -> 32) + tanh on the MXU, N = batch (lane axis).
    h = jnp.dot(w2, h, preferred_element_type=jnp.float32)
    h = jnp.tanh(h + b2)                               # (H2, B_BLK)

    # layer_3: Linear(32 -> 1), bias=False.  N = 1 -> elementwise mul + sublane
    # (XLU) reduce; result is a lane-dense (1, B_BLK) row store.
    oT_ref[...] = jnp.sum(w3 * h, axis=0, keepdims=True).astype(oT_ref.dtype)


def mlp_forward_lanes(xT, packed):
    """Lane-major core: xT (d_in, B) with batch on lanes -> (1, B).

    Streams batch tiles over a 1-D grid; the packed parameter slab stays
    VMEM-resident across all grid steps.
    """
    d_in, B = xT.shape
    b_blk = min(DEFAULT_B_BLK, _round_up(B, 128))
    B_pad = _round_up(B, b_blk)
    if B_pad != B:
        # Zero-padded lanes are harmless (bounded through tanh) and sliced off.
        xT = jnp.pad(xT, ((0, 0), (0, B_pad - B)))

    outT = pl.pallas_call(
        mlp_kernel,
        out_shape=jax.ShapeDtypeStruct((1, B_pad), xT.dtype),
        grid=(B_pad // b_blk,),
        in_specs=[
            pl.BlockSpec((d_in, b_blk), lambda i: (0, i)),          # streamed x
            pl.BlockSpec((H1, PACKED_COLS), lambda i: (0, 0)),      # resident params
        ],
        out_specs=pl.BlockSpec((1, b_blk), lambda i: (0, i)),       # lane-dense out
        compiler_params=pltpu.CompilerParams(
            dimension_semantics=("parallel",)),                     # v7x: 2 TCs split grid
    )(xT, packed)

    return outT[:, :B] if B_pad != B else outT


@jax.jit
def mlp_forward(x, packed):
    """PyTorch-module semantics: x (B, d_in) -> (B, 1).

    The single x.T here is one op amortized over the whole batched grid call;
    callers that already keep data batch-on-lanes should use mlp_forward_lanes
    directly and skip it. The final reshape (1,B)->(B,1) is layout-free.
    """
    B = x.shape[0]
    outT = mlp_forward_lanes(x.T, packed)
    return outT.reshape(B, D_OUT)


# ----------------------------- parameters ----------------------------------

def xavier_normal(key, fan_out, fan_in, dtype=jnp.float32):
    std = (2.0 / (fan_in + fan_out)) ** 0.5
    return std * jax.random.normal(key, (fan_out, fan_in), dtype=dtype)


def init_params(key):
    """PyTorch layouts: w (out_features, in_features), b (out_features,)."""
    k1, k2, k3, k4, k5 = jax.random.split(key, 5)
    w1 = xavier_normal(k1, H1, D_IN)                       # (32, 2)
    b1 = 0.1 * jax.random.normal(k4, (H1,), jnp.float32)   # (32,)
    w2 = xavier_normal(k2, H2, H1)                         # (32, 32)
    b2 = 0.1 * jax.random.normal(k5, (H2,), jnp.float32)   # (32,)
    w3 = xavier_normal(k3, D_OUT, H2)                      # (1, 32), bias=False
    return w1, b1, w2, b2, w3


def pack_params(w1, b1, w2, b2, w3):
    """Pack all layers into one (32, 128) f32 slab: [w2 | w1 | b1 | b2 | w3^T | 0-pad]."""
    cols = jnp.concatenate(
        [w2, w1, b1.reshape(-1, 1), b2.reshape(-1, 1), w3.T], axis=1)   # (32, 37)
    return jnp.pad(cols, ((0, 0), (0, PACKED_COLS - cols.shape[1]))
                   ).astype(jnp.float32)                                # (32, 128)


def mlp_reference(x, w1, b1, w2, b2, w3):
    h = jnp.tanh(x @ w1.T + b1)
    h = jnp.tanh(h @ w2.T + b2)
    return h @ w3.T


# -------------------------------- demo --------------------------------------

if __name__ == "__main__":
    key = jax.random.PRNGKey(0)
    kx, kp = jax.random.split(key)

    params = init_params(kp)
    packed = pack_params(*params)      # pack once, reuse across calls

    # B=512 exercises the multi-step grid with full 128-lane tiles;
    # B=16 exercises the pad-to-128 path (original tiny-batch case).
    for B in (512, 16):
        x = jax.random.normal(jax.random.fold_in(kx, B), (B, D_IN), jnp.float32)
        out = jax.block_until_ready(mlp_forward(x, packed))
        ref = mlp_reference(x, *params)
        assert out.shape == (B, D_OUT)
        assert jnp.allclose(out, ref, atol=1e-4, rtol=1e-4), \
            f"Pallas output mismatch vs reference at B={B}"

    print("KERNEL_OK")
</pallas_src>

<mosaic_0001>
module attributes {stable_mosaic.version = 11 : i64} {
  func.func @mlp_kernel(%arg0: i32, %arg1: memref<2x256xf32, #tpu.memory_space<vmem>>, %arg2: memref<32x128xf32, #tpu.memory_space<vmem>>, %arg3: memref<1x256xf32, #tpu.memory_space<vmem>>) attributes {dimension_semantics = [#tpu.dimension_semantics<parallel>], iteration_bounds = array<i64: 2>, scalar_prefetch = 0 : i64, scratch_operands = 0 : i64, tpu.core_type = #tpu.core_type<tc>, window_params = [{transform_indices = @transform_0, window_bounds = array<i64: 2, 256>}, {pipeline_mode = #tpu.pipeline_mode<synchronous>, transform_indices = @transform_1, window_bounds = array<i64: 32, 128>}, {transform_indices = @transform_2, window_bounds = array<i64: 1, 256>}]} {
    %c0 = arith.constant 0 : index
    %c0_0 = arith.constant 0 : index
    %0 = vector.load %arg1[%c0, %c0_0] : memref<2x256xf32, #tpu.memory_space<vmem>>, vector<2x256xf32>
    %c0_1 = arith.constant 0 : index
    %c32 = arith.constant 32 : index
    %1 = vector.load %arg2[%c0_1, %c32] : memref<32x128xf32, #tpu.memory_space<vmem>>, vector<32x2xf32>
    %c0_2 = arith.constant 0 : index
    %c34 = arith.constant 34 : index
    %2 = vector.load %arg2[%c0_2, %c34] : memref<32x128xf32, #tpu.memory_space<vmem>>, vector<32x1xf32>
    %c0_3 = arith.constant 0 : index
    %c0_4 = arith.constant 0 : index
    %3 = vector.load %arg2[%c0_3, %c0_4] : memref<32x128xf32, #tpu.memory_space<vmem>>, vector<32x32xf32>
    %c0_5 = arith.constant 0 : index
    %c35 = arith.constant 35 : index
    %4 = vector.load %arg2[%c0_5, %c35] : memref<32x128xf32, #tpu.memory_space<vmem>>, vector<32x1xf32>
    %c0_6 = arith.constant 0 : index
    %c36 = arith.constant 36 : index
    %5 = vector.load %arg2[%c0_6, %c36] : memref<32x128xf32, #tpu.memory_space<vmem>>, vector<32x1xf32>
    %6 = vector.extract_strided_slice %1 {offsets = [0, 0], sizes = [32, 1], strides = [1, 1]} : vector<32x2xf32> to vector<32x1xf32>
    %7 = vector.extract_strided_slice %0 {offsets = [0, 0], sizes = [1, 256], strides = [1, 1]} : vector<2x256xf32> to vector<1x256xf32>
    %8 = vector.broadcast %6 : vector<32x1xf32> to vector<32x256xf32>
    %9 = vector.broadcast %7 : vector<1x256xf32> to vector<32x256xf32>
    %10 = arith.mulf %8, %9 : vector<32x256xf32>
    %11 = vector.extract_strided_slice %1 {offsets = [0, 1], sizes = [32, 1], strides = [1, 1]} : vector<32x2xf32> to vector<32x1xf32>
    %12 = vector.extract_strided_slice %0 {offsets = [1, 0], sizes = [1, 256], strides = [1, 1]} : vector<2x256xf32> to vector<1x256xf32>
    %13 = vector.broadcast %11 : vector<32x1xf32> to vector<32x256xf32>
    %14 = vector.broadcast %12 : vector<1x256xf32> to vector<32x256xf32>
    %15 = arith.mulf %13, %14 : vector<32x256xf32>
    %16 = arith.addf %10, %15 : vector<32x256xf32>
    %17 = vector.broadcast %2 : vector<32x1xf32> to vector<32x256xf32>
    %18 = arith.addf %16, %17 : vector<32x256xf32>
    %19 = math.tanh %18 : vector<32x256xf32>
    %cst = arith.constant dense<0.000000e+00> : vector<32x256xf32>
    %20 = tpu.matmul %3, %19, %cst {dimension_numbers = #tpu.dot_dimension_numbers<[1], [0], [0], [1], [0, 0, 1, 1], [], []>, precision = #tpu.contract_precision<fp32>} : vector<32x32xf32>, vector<32x256xf32>, vector<32x256xf32> -> vector<32x256xf32>
    %21 = vector.broadcast %4 : vector<32x1xf32> to vector<32x256xf32>
    %22 = arith.addf %20, %21 : vector<32x256xf32>
    %23 = math.tanh %22 : vector<32x256xf32>
    %24 = vector.broadcast %5 : vector<32x1xf32> to vector<32x256xf32>
    %25 = arith.mulf %24, %23 : vector<32x256xf32>
    %cst_7 = arith.constant dense<0.000000e+00> : vector<256xf32>
    %26 = vector.multi_reduction <add>, %25, %cst_7 [0] : vector<32x256xf32> to vector<256xf32>
    %27 = vector.shape_cast %26 : vector<256xf32> to vector<1x256xf32>
    %c0_8 = arith.constant 0 : index
    %c0_9 = arith.constant 0 : index
    %28 = vector.load %arg3[%c0_8, %c0_9] : memref<1x256xf32, #tpu.memory_space<vmem>>, vector<1x256xf32>
    tpu.vector_store %arg3[%c0_8, %c0_9], %27 {strides = array<i32>} : memref<1x256xf32, #tpu.memory_space<vmem>>, vector<1x256xf32>,
    return
  }
  func.func @transform_0(%arg0: i32) -> (i32, i32) {
    %c0_i32 = arith.constant 0 : i32
    %c0_i32_0 = arith.constant 0 : i32
    return %c0_i32, %arg0 : i32, i32
  }
  func.func @transform_1(%arg0: i32) -> (i32, i32) {
    %c0_i32 = arith.constant 0 : i32
    %c0_i32_0 = arith.constant 0 : i32
    %c0_i32_1 = arith.constant 0 : i32
    return %c0_i32, %c0_i32_0 : i32, i32
  }
  func.func @transform_2(%arg0: i32) -> (i32, i32) {
    %c0_i32 = arith.constant 0 : i32
    %c0_i32_0 = arith.constant 0 : i32
    return %c0_i32, %arg0 : i32, i32
  }
}

</mosaic_0001>

<bundles_post_ra>
// kernel: mlp_forward.1
= control target key start
LH: loop header
LB: loop body
LE: loop exit
PB: predicated region body
PF: predicated region fallthrough
CT: control target
= control target key end

     0   :  { %7 = vsyncpa [#allocation3], 0  ;;  %s1958_s0 = inlined_call_operand.hbm [shape: f32[2,512], index: 0, kind: input, shape index: {}]   ;;  %s1959_s1 = inlined_call_operand.hbm [shape: f32[32,128], index: 1, kind: input, shape index: {}]   ;;  %s1960_s2 = inlined_call_operand.hbm [shape: f32[1,512], index: 2, kind: output, shape index: {}]  }
   0x1   :  { %9 = vsyncpa [#allocation3 + $0x1], 0 }
   0x2   :  { %10 = vsyncpa [#allocation6], 0 }
   0x3   :  { %11 = vsyncpa [#allocation4], 0 }
   0x4   :  { %13 = vsyncpa [#allocation4 + $0x1], 0  ;;  %s1574_s9 = smov 0   ;;  %s1576_s10 = smov 0  }
   0x5   :  { %s1578_s11 = smov 0   ;;  %s1580_s12 = smov 0  }
   0x6 LB: > { %s1595_s13 = sadd.s32 4294967295, %s1545_s12   ;;  %s1194_s14 = sadd.s32 4294967294, %s1545_s12   ;;  %s1545_s12 = sphi %s1580_s12, %s1980_s12   ;;  %s1541_s11 = sphi %s1578_s11, %s1979_s11   ;;  %s1537_s10 = sphi %s1576_s10, %s1978_s10   ;;  %s1533_s9 = sphi %s1574_s9, %s1977_s9  }
   0x7   : > { %p39_p0 = scmp.ne.s32.totalorder %s1537_s10, %s1533_s9  ;;  %p1961_p1 = scmp.eq.s32.totalorder %s1595_s13, 0 }
   0x8   : > { %p90_p3 = scmp.eq.s32.totalorder %s1194_s14, 1  ;;  %p1195_p5 = scmp.ge.s32.totalorder %s1545_s12, 1 }
   0x9   : > { %p1604_p4 = por %p1961_p1, %p39_p0  ;;  %p97_p7 = scmp.lt.s32.totalorder %s1545_s12, 3 }
   0xa   : > { %p1609_p6 = por %p90_p3, %p39_p0  ;;  %s1547_s18 = smov [#allocation5]  }
   0xb   : > { %s1964_s15 = scalar_select %p1604_p4, 1, 0 }
   0xc   : > { %s1965_s16 = scalar_select %p1609_p6, 1, 0 }
   0xd   : > { %p1614_p8 = pnand %p1195_p5, %p97_p7  ;;  %s109_s19 = sshll.u32 %s1547_s18, 4  ;;  %s1618_s19 = int_to_ptr.vmem [resolvable:$true] %s109_s19 }
   0xe   : > { %s1630_s21 = sadd.s32 1, %s1545_s12   ;;  %s26_s22 = sadd.s32 1, %s1541_s11 }
   0xf   : > { %s1966_s17 = scalar_select %p1614_p8, 1, 0 }
  0x10   : > { %p1316_p9 = pneg %p1614_p8  ;;  %s23_s23 = ssub.s32 %s1545_s12, %s1630_s21 }
  0x11   : > { %s1417_s26 = scalar_lea.hbm %s1959_s1, 512 }
  0x12   : > { %p1625_p11 = pnand %p1316_p9, %p1961_p1  ;;  %p1418_p12 = scmp.ne.s32.totalorder %s1959_s1, %s1417_s26 }
  0x13   : > { %p1424_p5 = scmp.lt.u32.totalorder %s1417_s26, %s1959_s1 }
  0x14   : > { %p1419_p13 = pneg %p1625_p11 }
  0x16   : > { %p1420_p0 = pnand %p1419_p13, %p1418_p12 }
  0x18   : > { %p1421_p3 = pneg %p1420_p0 }
  0x1a   : > { %p1426_p7 = pnand %p1424_p5, %p1421_p3 }
  0x1c   : > { %1429 = shalt.err (!%p1426_p7)
}
  0x1d   : > { %s1430_s3 = scalar_lea.vmem %s1618_s19, 512  ;;  %p1438_p2 = scmp.lt.s32.totalorder %s1618_s19, %s1618_s19 }
  0x1e   : > { %p1431_p9 = scmp.ne.s32.totalorder %s1618_s19, %s1430_s3  ;;  %p1439_p6 = scmp.lt.s32.totalorder %s1430_s3, %s1430_s3 }
  0x20   : > { %p1433_p10 = pnand %p1431_p9, %p1419_p13  ;;  %p1440_p4 = por %p1439_p6, %p1438_p2 }
  0x22   : > { %p1434_p1 = pneg %p1433_p10 }
  0x24   : > { %p1441_p8 = pnand %p1440_p4, %p1434_p1 }
  0x26   : > { %1444 = shalt.err (!%p1441_p8)
}
  0x27   : > { %s1548_s4 = smov 128   ;;  %s1549_s5 = smov 8  }
  0x28   : > { %1319 = dma.hbm_to_vmem [thread:$0]  (!%p1625_p11), %s1959_s1, 512, %s1618_s19, [#allocation6], %s1548_s4, %s1548_s4, %s1549_s5  }
  0x29   : > { %p24_p2 = scmp.eq.s32.totalorder %s23_s23, 0  ;;  %p33_p1 = scmp.ne.s32.totalorder %s1541_s11, %s1537_s10 }
  0x2a   : > { %p34_p4 = scmp.eq.s32.totalorder %s1545_s12, 0  ;;  %p1329_p6 = scmp.lt.s32.totalorder %s1545_s12, 2 }
  0x2b   : > { %s1661_s8 = scalar_select %p24_p2, %s1541_s11, %s26_s22  }
  0x2c   : > { %p35_p8 = por %p34_p4, %p33_p1  ;;  %p1968_p10 = scmp.eq.s32.totalorder %s1595_s13, 1 }
  0x2d   : > { %s123_s18 = sand.u32 1, %s1541_s11   ;;  %s1210_s24 = sshll.u32 %s1545_s12, 6 }
  0x2e   : > { %p1665_p12 = por %p1968_p10, %p33_p1  ;;  %s1198_s25 = sshll.u32 %s123_s18, 2 }
  0x2f   : > { %s1674_s27 = scalar_lea.hbm %s1958_s0, %s1210_s24  ;;  %s127_s19 = scalar_lea.vmem [#allocation2], %s1198_s25 }
  0x30   : > { %s135_s22 = sshll.u32 %s127_s19, 4  ;;  %p1676_p11 = pnand %p1329_p6, %p35_p8  ;;  %s1680_s22 = int_to_ptr.vmem [resolvable:$true] %s135_s22 }
  0x31   : > { %s124_s28 = scalar_lea.sflag [#allocation3], %s123_s18  ;;  %s1445_s29 = scalar_lea.hbm %s1674_s27, 64 }
  0x32   : > { %p1446_p13 = scmp.ne.s32.totalorder %s1674_s27, %s1445_s29  ;;  %p1447_p0 = pneg %p1676_p11 }
  0x33   : > { %s1450_s4 = scalar_lea.hbm %s1958_s0, 128  ;;  %p1451_p7 = scmp.lt.u32.totalorder %s1674_s27, %s1958_s0 }
  0x34   : > { %p1448_p3 = pnand %p1447_p0, %p1446_p13  ;;  %p1452_p9 = scmp.lt.u32.totalorder %s1450_s4, %s1445_s29 }
  0x35   : > { %p1454_p1 = scmp.lt.u32.totalorder %s1445_s29, %s1674_s27 }
  0x36   : > { %p1449_p5 = pneg %p1448_p3  ;;  %p1453_p2 = por %p1452_p9, %p1451_p7 }
  0x38   : > { %p1455_p4 = por %p1454_p1, %p1453_p2 }
  0x3a   : > { %p1456_p6 = pnand %p1455_p4, %p1449_p5 }
  0x3c   : > { %1459 = shalt.err (!%p1456_p6)
}
  0x3d   : > { %s1460_s7 = scalar_lea.vmem %s1680_s22, 64  ;;  %s1550_s18 = smov [#allocation2]  }
  0x3e   : > { %p1461_p8 = scmp.ne.s32.totalorder %s1680_s22, %s1460_s7  ;;  %s1465_s24 = sshll.u32 %s1550_s18, 4  ;;  %s1466_s24 = int_to_ptr.vmem [resolvable:$false] %s1465_s24 }
  0x3f   : > { %s1467_s25 = scalar_lea.vmem %s1466_s24, 128  ;;  %p1468_p3 = scmp.lt.s32.totalorder %s1680_s22, %s1466_s24 }
  0x40   : > { %p1463_p10 = pnand %p1461_p8, %p1447_p0  ;;  %p1469_p7 = scmp.lt.s32.totalorder %s1467_s25, %s1460_s7 }
  0x42   : > { %p1464_p13 = pneg %p1463_p10  ;;  %p1470_p9 = por %p1469_p7, %p1468_p3 }
  0x44   : > { %p1471_p2 = pnand %p1470_p9, %p1464_p13 }
  0x46   : > { %1474 = shalt.err (!%p1471_p2)
}
  0x47   : > { %1323 = dma.hbm_to_vmem [thread:$0]  (!%p1676_p11), %s1674_s27, 64, %s1680_s22, %s124_s28  }
  0x48   : > { %p1971_p5 = scmp.ne.s32.totalorder %s1966_s17, 0 }
  0x49   : > { %s1710_s20 = sand.u32 (!%p1971_p5), 1, %s1537_s10   ;;  %p1972_p0 = scmp.ne.s32.totalorder (!%p1971_p5), %s1964_s15, 0 }
  0x4a   : > { %144 = sbr.rel (%p1971_p5) target bundleno = 572 (0x23c), region = 28  ;;  %s1202_s26 = sshll.u32 (!%p1971_p5), %s1710_s20, 2 }
  0x4b   : > { %s147_s19 = scalar_lea.sflag (!%p1971_p5), [#allocation3], %s1710_s20  ;;  %s1714_s29 = scalar_lea.vmem (!%p1971_p5), [#allocation2], %s1202_s26 }
  0x51   : > { %1520 = dma.done.wait (%p1972_p0), %s147_s19, 64  }
  0x52   : > { %1522 = vsyncadd (%p1972_p0), %s147_s19, 4294967232  ;;  %p1973_p11 = scmp.eq.s32.totalorder %s1595_s13, 0 }
  0x54   : > { %1524 = dma.done.wait (%p1973_p11), [#allocation6], 512   ;;  %p1974_p1 = pmov %p1973_p11 }
  0x55   : > { %v1551_v0 = vmov 33   ;;  %v1552_v1 = vmov 32   ;;  %v1724_v2 = vld [vmem:[#allocation5] sm:$0xff]  ;;  %v1728_v3 = vld [vmem:[#allocation5 + $0x8] sm:$0xff]  ;;  %v1732_v4 = vld [vmem:[#allocation5 + $0x10] sm:$0xff]  ;;  %v1553_v6 = vmov 34   ;;  %v203_v10 = vlaneseq }
  0x56   : > { %1526 = vsyncadd (%p1974_p1), [#allocation6], 4294966784  ;;  %1375 = vset.pattern.permute.xlu1 %v1551_v0  ;;  %1374 = vset.pattern.permute.xlu0 %v1552_v1  ;;  %v1734_v5 = vld [vmem:[#allocation5 + $0x18] sm:$0xff]  ;;  %v1554_v7 = vmov 0.0   ;;  %v1555_v8 = vmov 35   ;;  %v1556_v9 = vmov 36  }
  0x57   : > { %230 = vperm.xlu1 %1375, %v1724_v2   ;;  %184 = vperm.xlu0 %1374, %v1724_v2   ;;  %v1755_v11 = vshrl.u32 %v203_v10, 7  ;;  %v177_v18 = vld [vmem:[%s1714_s29] sm:$0xf]  ;;  %vm327_vm0 = vcmask 261120   ;;  %s1204_s15 = sshll.u32 %s1710_s20, 1  ;;  %s1211_s17 = sshll.u32 %s1595_s13, 5 }
  0x58   : > { %408 = vmatprep.mubr.f32.mxu1 %v1554_v7  ;;  %771 = vmatprep.mubr.f32.mxu0 %v1554_v7  ;;  %v328_v43 = vsel %vm327_vm0, %v1724_v2, 0  ;;  %s174_s27 = scalar_lea.vmem [#allocation7], %s1204_s15  ;;  %vm1096_vm1 = vcmp.lt.s32.totalorder %v203_v10, 256  ;;  %s1914_s30 = scalar_lea.hbm %s1960_s2, %s1211_s17 }
  0x59   : > { %v247_v14 = vsub.s32 1, %v1755_v11  ;;  %v251_v15 = vsub.s32 3, %v1755_v11  ;;  %v205_v16 = vsub.s32 0, %v1755_v11  ;;  %v209_v17 = vsub.s32 2, %v1755_v11  ;;  %s1114_s22 = sshll.u32 %s174_s27, 4  ;;  %s1100_s3 = scalar_lea.sflag [#allocation4], %s1710_s20  ;;  %s1916_s22 = int_to_ptr.vmem [resolvable:$true] %s1114_s22 }
  0x5a   : > { %v1764_v57 = vand.u32 4294901760, %v328_v43  ;;  %s1475_s4 = scalar_lea.vmem %s1916_s22, 32  ;;  %s1558_s13 = smov [#allocation7]  }
  0x5b   : > { %234 = vperm.xlu1 %1375, %v1728_v3   ;;  %189 = vperm.xlu0 %1374, %v1728_v3   ;;  %v248_v21 = vrot.slane %v177_v18, %v247_v14  ;;  %v252_v22 = vrot.slane %v177_v18, %v251_v15  ;;  %v206_v23 = vrot.slane %v177_v18, %v205_v16  ;;  %p1476_p4 = scmp.ne.s32.totalorder %s1916_s22, %s1475_s4  ;;  %s1479_s5 = sshll.u32 %s1558_s13, 4  ;;  %s1480_s5 = int_to_ptr.vmem [resolvable:$false] %s1479_s5 }
  0x5c   : > { %v210_v24 = vrot.slane %v177_v18, %v209_v17  ;;  %s1481_s6 = scalar_lea.vmem %s1480_s5, 64  ;;  %p1482_p10 = scmp.lt.s32.totalorder %s1916_s22, %s1480_s5 }
  0x5d   : > { %v258_v27 = vrot.slane %v248_v21, %v247_v14  ;;  %v262_v28 = vrot.slane %v252_v22, %v247_v14  ;;  %v216_v29 = vrot.slane %v206_v23, %v205_v16  ;;  %v330_v14 = vsel %vm327_vm0, %v1728_v3, 0  ;;  %p1477_p6 = pnand %p1476_p4, %p1665_p12  ;;  %p1483_p13 = scmp.lt.s32.totalorder %s1481_s6, %s1475_s4 }
  0x5e   : > { %v220_v30 = vrot.slane %v210_v24, %v205_v16  ;;  %v1772_v17 = vand.u32 4294901760, %v330_v14 }
  0x5f   : > { %1376 = vset.pattern.permute.xlu1 %v1552_v1  ;;  %194 = vperm.xlu0 %1374, %v1732_v4   ;;  %p1478_p8 = pneg %p1477_p6  ;;  %p1484_p3 = por %p1483_p13, %p1482_p10 }
  0x60   : > { %199 = vperm.xlu1 %1376, %v1734_v5  }
  0x61   : > { %p1485_p7 = pnand %p1484_p3, %p1478_p8 }
  0x63   : > { %1377 = vset.pattern.permute.xlu0 %v1551_v0 }
  0x64   : > { %1378 = vset.pattern.permute.xlu1 %v1551_v0  ;;  %238 = vperm.xlu0 %1377, %v1732_v4  }
  0x65   : > { %242 = vperm.xlu1 %1378, %v1734_v5  }
  0x68   : > { %1380 = vset.pattern.permute.xlu0 %v1553_v6 }
  0x69   : > { %1379 = vset.pattern.permute.xlu1 %v1553_v6  ;;  %284 = vperm.xlu0 %1380, %v1728_v3  }
  0x6a   : > { %280 = vperm.xlu1 %1379, %v1724_v2  }
  0x6d   : > { %1381 = vset.pattern.permute.xlu0 %v1555_v8 }
  0x6e   : > { %288 = vperm.xlu1 %1379, %v1732_v4   ;;  %312 = vperm.xlu0 %1381, %v1724_v2  }
  0x72   : > { %292 = vperm.xlu1 %1379, %v1734_v5   ;;  %324 = vperm.xlu0 %1381, %v1734_v5  }
  0x76   : > { %1382 = vset.pattern.permute.xlu1 %v1555_v8  ;;  %1384 = vset.pattern.permute.xlu0 %v1556_v9  ;;  %v1767_v8 = vsub.f32 %v328_v43, %v1764_v57 }
  0x77   : > { %316 = vperm.xlu1 %1382, %v1728_v3   ;;  %1039 = vperm.xlu0 %1384, %v1728_v3  }
  0x78   : > { %v411_v15 = vand.u32 4294901760, %v1767_v8 }
  0x7a   : > { %v1781_v3 = vsub.f32 %v1767_v8, %v411_v15 }
  0x7b   : > { %320 = vperm.xlu1 %1382, %v1732_v4  }
  0x7f   : > { %1383 = vset.pattern.permute.xlu1 %v1556_v9 }
  0x80   : > { %1035 = vperm.xlu1 %1383, %v1724_v2  }
  0x84   : > { %1043 = vperm.xlu1 %1383, %v1732_v4  }
  0x88   : > { %1047 = vperm.xlu1 %1383, %v1734_v5  }
  0xd6   : > { %v231_v12 = vpop.permute.xlu1 %230  ;;  %v185_v13 = vpop.permute.xlu0 %184 }
  0xd7   : > { %v263_v36 = vmul.f32 %v258_v27, %v231_v12  ;;  %v264_v37 = vmul.f32 %v262_v28, %v231_v12  ;;  %v221_v38 = vmul.f32 %v216_v29, %v185_v13  ;;  %v222_v39 = vmul.f32 %v220_v30, %v185_v13 }
  0xd9   : > { %v271_v47 = vadd.f32 %v263_v36, %v221_v38  ;;  %v272_v48 = vadd.f32 %v264_v37, %v222_v39 }
  0xda   : > { %v235_v19 = vpop.permute.xlu1 %234  ;;  %v190_v20 = vpop.permute.xlu0 %189 }
  0xdb   : > { %v265_v31 = vmul.f32 %v258_v27, %v235_v19  ;;  %v266_v32 = vmul.f32 %v262_v28, %v235_v19  ;;  %v223_v33 = vmul.f32 %v216_v29, %v190_v20  ;;  %v224_v34 = vmul.f32 %v220_v30, %v190_v20 }
  0xdc   : > { %v332_v20 = vsel %vm327_vm0, %v1732_v4, 0 }
  0xdd   : > { %v273_v41 = vadd.f32 %v265_v31, %v223_v33  ;;  %v274_v42 = vadd.f32 %v266_v32, %v224_v34  ;;  %v334_v33 = vsel %vm327_vm0, %v1734_v5, 0 }
  0xde   : > { %v195_v25 = vpop.permute.xlu0 %194 }
  0xdf   : > { %v200_v26 = vpop.permute.xlu1 %199  ;;  %v225_v52 = vmul.f32 %v216_v29, %v195_v25  ;;  %v226_v53 = vmul.f32 %v220_v30, %v195_v25 }
  0xe0   : > { %v227_v61 = vmul.f32 %v216_v29, %v200_v26  ;;  %v228_v63 = vmul.f32 %v220_v30, %v200_v26  ;;  %v1788_v29 = vand.u32 4294901760, %v332_v20 }
  0xe3   : > { %v239_v35 = vpop.permute.xlu0 %238 }
  0xe4   : > { %v243_v40 = vpop.permute.xlu1 %242  ;;  %v267_v44 = vmul.f32 %v258_v27, %v239_v35  ;;  %v268_v45 = vmul.f32 %v262_v28, %v239_v35 }
  0xe5   : > { %v269_v56 = vmul.f32 %v258_v27, %v243_v40  ;;  %v270_v58 = vmul.f32 %v262_v28, %v243_v40  ;;  %v1786_v28 = vsub.f32 %v330_v14, %v1772_v17 }
  0xe6   : > { %v275_v59 = vadd.f32 %v267_v44, %v225_v52  ;;  %v276_v60 = vadd.f32 %v268_v45, %v226_v53 }
  0xe7   : > { %v277_v2 = vadd.f32 %v269_v56, %v227_v61  ;;  %v278_v6 = vadd.f32 %v270_v58, %v228_v63  ;;  %v422_v43 = vand.u32 4294901760, %v1786_v28 }
  0xe8   : > { %v285_v46 = vpop.permute.xlu0 %284 }
  0xe9   : > { %v297_v49 = vadd.f32 %v285_v46, %v273_v41  ;;  %v298_v50 = vadd.f32 %v285_v46, %v274_v42  ;;  %v281_v51 = vpop.permute.xlu1 %280  ;;  %v413_v46 = vand.u32 4294901760, %v1781_v3 }
  0xea   : > { %v295_v54 = vadd.f32 %v281_v51, %v271_v47  ;;  %v296_v55 = vadd.f32 %v281_v51, %v272_v48  ;;  %v1816_v47 = vsub.f32 %v332_v20, %v1788_v29  ;;  %v1818_v48 = vand.u32 4294901760, %v334_v33 }
  0xeb   : > { %1385 = vtanh.f32 %v297_v49 }
  0xec   : > { %1387 = vtanh.f32 %v298_v50 }
  0xed   : > { %1389 = vtanh.f32 %v295_v54  ;;  %v289_v62 = vpop.permute.xlu1 %288 }
  0xee   : > { %1391 = vtanh.f32 %v296_v55  ;;  %v299_v0 = vadd.f32 %v289_v62, %v275_v59  ;;  %v300_v1 = vadd.f32 %v289_v62, %v276_v60  ;;  %v423_v62 = vsub.f32 %v1786_v28, %v422_v43 }
  0xf0   : > { %1393 = vtanh.f32 %v299_v0 }
  0xf1   : > { %1395 = vtanh.f32 %v300_v1  ;;  %v293_v9 = vpop.permute.xlu1 %292  ;;  %v433_v1 = vand.u32 4294901760, %v1816_v47 }
  0xf2   : > { %v301_v12 = vadd.f32 %v293_v9, %v277_v2  ;;  %v302_v13 = vadd.f32 %v293_v9, %v278_v6  ;;  %v1838_v2 = vsub.f32 %v334_v33, %v1818_v48 }
  0xf4   : > { %1397 = vtanh.f32 %v301_v12 }
  0xf5   : > { %v1386_v16 = vpop.eup %1385  ;;  %1399 = vtanh.f32 %v302_v13 }
  0xf6   : > { %v1388_v18 = vpop.eup %1387  ;;  %v342_v19 = vand.u32 4294901760, %v1386_v16 }
  0xf7   : > { %v1390_v21 = vpop.eup %1389  ;;  %v340_v22 = vand.u32 4294901760, %v1388_v18 }
  0xf8   : > { %v1392_v23 = vpop.eup %1391  ;;  %v338_v24 = vand.u32 4294901760, %v1390_v21  ;;  %v1776_v25 = vsub.f32 %v1386_v16, %v342_v19 }
  0xf9   : > { %v336_v26 = vand.u32 4294901760, %v1392_v23  ;;  %v1783_v27 = vsub.f32 %v1388_v18, %v340_v22 }
  0xfa   : > { %v1394_v4 = vpop.eup %1393  ;;  %v1790_v30 = vpack.c.bf16 %v342_v19, %v338_v24  ;;  %v1792_v31 = vsub.f32 %v1390_v21, %v338_v24  ;;  %v473_v32 = vand.u32 4294901760, %v1776_v25  ;;  %v424_v21 = vand.u32 4294901760, %v423_v62 }
  0xfb   : > { %v1396_v34 = vpop.eup %1395  ;;  %v1797_v35 = vpack.c.bf16 %v340_v22, %v336_v26  ;;  %v1799_v36 = vsub.f32 %v1392_v23, %v336_v26  ;;  %v346_v37 = vand.u32 4294901760, %v1394_v4  ;;  %v467_v38 = vand.u32 4294901760, %v1783_v27 }
  0xfc   : > { %v344_v39 = vand.u32 4294901760, %v1396_v34  ;;  %v461_v40 = vand.u32 4294901760, %v1792_v31  ;;  %v474_v53 = vsub.f32 %v1776_v25, %v473_v32  ;;  %v434_v23 = vsub.f32 %v1816_v47, %v433_v1 }
  0xfd   : > { %1213 = vmatprep.subr.bf16.mxu1 %v1797_v35  ;;  %1237 = vmatprep.subr.bf16.mxu0 %v1797_v35  ;;  %v1805_v41 = vsub.f32 %v1394_v4, %v346_v37  ;;  %v455_v42 = vand.u32 4294901760, %v1799_v36  ;;  %v468_v5 = vsub.f32 %v1783_v27, %v467_v38 }
  0xfe   : > { %v1398_v44 = vpop.eup %1397  ;;  %1215 = vmatpush1.bf16.msra.mxu1 %v1790_v30  ;;  %1239 = vmatpush1.bf16.msra.mxu0 %v1790_v30  ;;  %v1812_v45 = vsub.f32 %v1396_v34, %v344_v39  ;;  %v462_v52 = vsub.f32 %v1792_v31, %v461_v40  ;;  %v475_v9 = vand.u32 4294901760, %v474_v53  ;;  %v1246_v3 = vpack.c.bf16 %v473_v32, %v461_v40 }
  0xff   : > { %v1400_v49 = vpop.eup %1399  ;;  %v350_v50 = vand.u32 4294901760, %v1398_v44  ;;  %v456_v51 = vsub.f32 %v1799_v36, %v455_v42  ;;  %v469_v55 = vand.u32 4294901760, %v468_v5  ;;  %v485_v58 = vand.u32 4294901760, %v1805_v41 }
 0x100   : > { %v348_v54 = vand.u32 4294901760, %v1400_v49  ;;  %v479_v56 = vand.u32 4294901760, %v1812_v45  ;;  %v463_v6 = vand.u32 4294901760, %v462_v52  ;;  %v1244_v16 = vpack.c.bf16 %v467_v38, %v455_v42 }
 0x101   : > { %v1825_v59 = vpack.c.bf16 %v350_v50, %v346_v37  ;;  %v1827_v60 = vsub.f32 %v1398_v44, %v350_v50  ;;  %v457_v61 = vand.u32 4294901760, %v456_v51  ;;  %v486_v12 = vsub.f32 %v1805_v41, %v485_v58 }
 0x102   : > { %v1832_v63 = vpack.c.bf16 %v348_v54, %v344_v39  ;;  %v1834_v0 = vsub.f32 %v1400_v49, %v348_v54  ;;  %v480_v19 = vsub.f32 %v1812_v45, %v479_v56  ;;  %v1222_v24 = vpack.c.bf16 %v475_v9, %v463_v6 }
 0x103   : > { %v497_v13 = vand.u32 4294901760, %v1827_v60  ;;  %v1220_v14 = vpack.c.bf16 %v469_v55, %v457_v61  ;;  %v487_v26 = vand.u32 4294901760, %v486_v12  ;;  %v444_v38 = vand.u32 4294901760, %v1838_v2 }
 0x104   : > { %1217 = vmatprep.subr.bf16.mxu1 %v1832_v63  ;;  %1241 = vmatprep.subr.bf16.mxu0 %v1832_v63  ;;  %v491_v18 = vand.u32 4294901760, %v1834_v0  ;;  %v481_v34 = vand.u32 4294901760, %v480_v19  ;;  %v435_v40 = vand.u32 4294901760, %v434_v23 }
 0x105   : > { %1219 = vmatpush1.bf16.msra.mxu1 %v1825_v59  ;;  %1243 = vmatpush1.bf16.msra.mxu0 %v1825_v59  ;;  %v498_v20 = vsub.f32 %v1827_v60, %v497_v13  ;;  %v1250_v32 = vpack.c.bf16 %v497_v13, %v485_v58  ;;  %v445_v5 = vsub.f32 %v1838_v2, %v444_v38 }
 0x106   : > { %1221 = vmatprep.subr.bf16.mxu1 %v1220_v14  ;;  %1245 = vmatprep.subr.bf16.mxu0 %v1244_v16  ;;  %v492_v22 = vsub.f32 %v1834_v0, %v491_v18  ;;  %v1248_v33 = vpack.c.bf16 %v491_v18, %v479_v56 }
 0x107   : > { %v499_v4 = vand.u32 4294901760, %v498_v20  ;;  %v446_v44 = vand.u32 4294901760, %v445_v5 }
 0x108   : > { %414 = vmatmul.mubr.f32.vlgmr.msra.gmra.mrb[0].mxu1 %v413_v46  ;;  %775 = vmatmul.mubr.f32.vlgmr.msra.gmra.mrb[0].mxu0 %v411_v15  ;;  %v493_v37 = vand.u32 4294901760, %v492_v22  ;;  %v1228_v15 = vpack.c.bf16 %v1783_v27, %v1799_v36  ;;  %v1230_v27 = vpack.c.bf16 %v1776_v25, %v1792_v31  ;;  %v1234_v36 = vpack.c.bf16 %v1827_v60, %v1805_v41  ;;  %v317_v25 = vpop.permute.xlu1 %316 }
 0x109   : > { %1223 = vmatpush1.bf16.msra.mxu1 %v1222_v24  ;;  %1247 = vmatpush1.bf16.msra.mxu0 %v1246_v3  ;;  %v1226_v39 = vpack.c.bf16 %v499_v4, %v487_v26 }
 0x10a   : > { %1249 = vmatprep.subr.bf16.mxu0 %v1248_v33  ;;  %419 = vmatprep.mubr.f32.mxu1 %v1554_v7  ;;  %v1224_v42 = vpack.c.bf16 %v493_v37, %v481_v34 }
 0x10b   : > { %780 = vmatprep.mubr.f32.mxu0 %v1554_v7 }
 0x10c   : > { %425 = vmatmul.mubr.f32.gmra.mrb[2].mxu1 %v424_v21  ;;  %1225 = vmatprep.subr.bf16.mxu1 %v1224_v42  ;;  %v321_v51 = vpop.permute.xlu1 %320 }
 0x10d   : > { %784 = vmatmul.mubr.f32.gmra.mrb[2].mxu0 %v422_v43  ;;  %1227 = vmatpush1.bf16.msra.mxu1 %v1226_v39 }
 0x10e   : > { %1251 = vmatpush1.bf16.msra.mxu0 %v1250_v32  ;;  %1229 = vmatprep.subr.bf16.mxu1 %v1228_v15 }
 0x10f   : > { %1253 = vmatprep.subr.bf16.mxu0 %v1797_v35  ;;  %430 = vmatprep.mubr.f32.mxu1 %v1554_v7  ;;  %v1232_v35 = vpack.c.bf16 %v1834_v0, %v1812_v45 }
 0x110   : > { %789 = vmatprep.mubr.f32.mxu0 %v1554_v7  ;;  %436 = vmatmul.mubr.f32.gmra.mrb[4].mxu1 %v435_v40  ;;  %v1036_v13 = vpop.permute.xlu1 %1035 }
 0x111   : > { %793 = vmatmul.mubr.f32.gmra.mrb[4].mxu0 %v433_v1  ;;  %441 = vmatprep.mubr.f32.mxu1 %v1554_v7 }
 0x112   : > { %798 = vmatprep.mubr.f32.mxu0 %v1554_v7 }
 0x114   : > { %447 = vmatmul.mubr.f32.gmra.mrb[6].mxu1 %v446_v44  ;;  %v1044_v3 = vpop.permute.xlu1 %1043 }
 0x115   : > { %802 = vmatmul.mubr.f32.gmra.mrb[6].mxu0 %v444_v38  ;;  %557 = vmatprep.mubr.f32.mxu1 %v1554_v7 }
 0x116   : > { %896 = vmatprep.mubr.f32.mxu0 %v1554_v7 }
 0x118   : > { %559 = vmatmul.mubr.f32.vlgmr.msra.gmra.mrb[0].mxu1 %v1764_v57  ;;  %v1048_v15 = vpop.permute.xlu1 %1047 }
 0x119   : > { %1231 = vmatpush1.bf16.msra.mxu1 %v1230_v27  ;;  %898 = vmatmul.mubr.f32.vlgmr.msra.gmra.mrb[0].mxu0 %v1764_v57 }
 0x11a   : > { %1255 = vmatpush1.bf16.msra.mxu0 %v1790_v30  ;;  %1233 = vmatprep.subr.bf16.mxu1 %v1232_v35 }
 0x11b   : > { %1257 = vmatprep.subr.bf16.mxu0 %v1832_v63  ;;  %564 = vmatprep.mubr.f32.mxu1 %v1554_v7 }
 0x11c   : > { %903 = vmatprep.mubr.f32.mxu0 %v1554_v7  ;;  %566 = vmatmul.mubr.f32.gmra.mrb[2].mxu1 %v1772_v17 }
 0x11d   : > { %1235 = vmatpush1.bf16.msra.mxu1 %v1234_v36  ;;  %905 = vmatmul.mubr.f32.gmra.mrb[2].mxu0 %v1772_v17 }
 0x11e   : > { %1259 = vmatpush1.bf16.msra.mxu0 %v1825_v59  ;;  %571 = vmatprep.mubr.f32.mxu1 %v1554_v7 }
 0x11f   : > { %910 = vmatprep.mubr.f32.mxu0 %v1554_v7 }
 0x120   : > { %573 = vmatmul.mubr.f32.gmra.mrb[4].mxu1 %v1788_v29 }
 0x121   : > { %912 = vmatmul.mubr.f32.gmra.mrb[4].mxu0 %v1788_v29  ;;  %578 = vmatprep.mubr.f32.mxu1 %v1554_v7 }
 0x122   : > { %917 = vmatprep.mubr.f32.mxu0 %v1554_v7 }
 0x124   : > { %580 = vmatmul.mubr.f32.gmra.mrb[6].mxu1 %v1818_v48 }
 0x125   : > { %919 = vmatmul.mubr.f32.gmra.mrb[6].mxu0 %v1818_v48  ;;  %666 = vmatprep.mubr.f32.mxu1 %v1554_v7 }
 0x126   : > { %997 = vmatprep.mubr.f32.mxu0 %v1554_v7 }
 0x128   : > { %669 = vmatmul.mubr.f32.vlgmr.msra.gmra.mrb[0].mxu1 %v1767_v8 }
 0x129   : > { %999 = vmatmul.mubr.f32.vlgmr.msra.gmra.mrb[0].mxu0 %v1764_v57  ;;  %674 = vmatprep.mubr.f32.mxu1 %v1554_v7  ;;  %v313_v57 = vpop.permute.xlu0 %312 }
 0x12a   : > { %1004 = vmatprep.mubr.f32.mxu0 %v1554_v7 }
 0x12c   : > { %677 = vmatmul.mubr.f32.gmra.mrb[2].mxu1 %v1786_v28 }
 0x12d   : > { %1006 = vmatmul.mubr.f32.gmra.mrb[2].mxu0 %v1772_v17  ;;  %682 = vmatprep.mubr.f32.mxu1 %v1554_v7  ;;  %v325_v62 = vpop.permute.xlu0 %324 }
 0x12e   : > { %1011 = vmatprep.mubr.f32.mxu0 %v1554_v7 }
 0x130   : > { %685 = vmatmul.mubr.f32.gmra.mrb[4].mxu1 %v1816_v47 }
 0x131   : > { %1013 = vmatmul.mubr.f32.gmra.mrb[4].mxu0 %v1788_v29  ;;  %690 = vmatprep.mubr.f32.mxu1 %v1554_v7  ;;  %v1040_v18 = vpop.permute.xlu0 %1039 }
 0x132   : > { %1018 = vmatprep.mubr.f32.mxu0 %v1554_v7 }
 0x134   : > { %693 = vmatmul.mubr.f32.gmra.mrb[6].mxu1 %v1838_v2 }
 0x135   : > { %1020 = vmatmul.mubr.f32.gmra.mrb[6].mxu0 %v1818_v48 }
 0x1fb   : > { %v670_v8 = vpop.f32.mrb[0].mxu1 }
 0x1fc   : > { %v1260_v17 = vadd.f32 %v670_v8, %v313_v57  ;;  %v1000_v28 = vpop.f32.mrb[0].mxu0  ;;  %v672_v30 = vpop.f32.mrb[1].mxu1 }
 0x1fd   : > { %v1262_v31 = vadd.f32 %v672_v30, %v313_v57  ;;  %v1002_v41 = vpop.f32.mrb[1].mxu0 }
 0x1fe   : > { %v1261_v43 = vadd.f32 %v1260_v17, %v1000_v28  ;;  %v1557_v17 = vmov 1966171168  }
 0x1ff   : > { %v1263_v45 = vadd.f32 %v1262_v31, %v1002_v41  ;;  %v678_v46 = vpop.f32.mrb[2].mxu1  ;;  %v1080_v28 = vunpack.c.l.s4 %v1557_v17 }
 0x200   : > { %v1264_v29 = vadd.f32 %v678_v46, %v317_v25  ;;  %v1007_v47 = vpop.f32.mrb[2].mxu0  ;;  %v680_v49 = vpop.f32.mrb[3].mxu1  ;;  %1401 = vtanh.f32 %v1261_v43 }
 0x201   : > { %v1266_v50 = vadd.f32 %v680_v49, %v317_v25  ;;  %v1009_v7 = vpop.f32.mrb[3].mxu0  ;;  %1403 = vtanh.f32 %v1263_v45  ;;  %v1081_v45 = vunpack.c.0.s8 %v1080_v28 }
 0x202   : > { %v1265_v52 = vadd.f32 %v1264_v29, %v1007_v47 }
 0x203   : > { %v1267_v48 = vadd.f32 %v1266_v50, %v1009_v7  ;;  %v686_v53 = vpop.f32.mrb[4].mxu1  ;;  %v1084_v50 = vsub.s32 %v1081_v45, %v1755_v11 }
 0x204   : > { %1405 = vtanh.f32 %v1265_v52  ;;  %v1268_v54 = vadd.f32 %v686_v53, %v321_v51  ;;  %v1014_v55 = vpop.f32.mrb[4].mxu0  ;;  %v688_v56 = vpop.f32.mrb[5].mxu1 }
 0x205   : > { %1407 = vtanh.f32 %v1267_v48  ;;  %v1270_v58 = vadd.f32 %v688_v56, %v321_v51  ;;  %v1016_v59 = vpop.f32.mrb[5].mxu0 }
 0x206   : > { %v1269_v60 = vadd.f32 %v1268_v54, %v1014_v55 }
 0x207   : > { %v1271_v61 = vadd.f32 %v1270_v58, %v1016_v59  ;;  %v694_v63 = vpop.f32.mrb[6].mxu1 }
 0x208   : > { %1409 = vtanh.f32 %v1269_v60  ;;  %v1272_v0 = vadd.f32 %v694_v63, %v325_v62  ;;  %v1021_v1 = vpop.f32.mrb[6].mxu0  ;;  %v696_v2 = vpop.f32.mrb[7].mxu1 }
 0x209   : > { %1411 = vtanh.f32 %v1271_v61  ;;  %v1274_v6 = vadd.f32 %v696_v2, %v325_v62  ;;  %v1023_v9 = vpop.f32.mrb[7].mxu0 }
 0x20a   : > { %v1273_v12 = vadd.f32 %v1272_v0, %v1021_v1  ;;  %v1402_v16 = vpop.eup %1401 }
 0x20b   : > { %v1275_v14 = vadd.f32 %v1274_v6, %v1023_v9  ;;  %v1404_v19 = vpop.eup %1403  ;;  %v1050_v22 = vmul.f32 %v1402_v16, %v1036_v13 }
 0x20c   : > { %1413 = vtanh.f32 %v1273_v12  ;;  %v1051_v24 = vmul.f32 %v1404_v19, %v1036_v13 }
 0x20d   : > { %1415 = vtanh.f32 %v1275_v14 }
 0x20e   : > { %v1406_v20 = vpop.eup %1405 }
 0x20f   : > { %v1408_v21 = vpop.eup %1407  ;;  %v1052_v23 = vmul.f32 %v1406_v20, %v1040_v18 }
 0x210   : > { %v1053_v26 = vmul.f32 %v1408_v21, %v1040_v18 }
 0x211   : > { %v1058_v4 = vadd.f32 %v1052_v23, %v1050_v22 }
 0x212   : > { %v1410_v33 = vpop.eup %1409  ;;  %v1067_v34 = vadd.f32 %v1053_v26, %v1051_v24 }
 0x213   : > { %v1412_v37 = vpop.eup %1411  ;;  %v1054_v38 = vmul.f32 %v1410_v33, %v1044_v3 }
 0x214   : > { %v1055_v39 = vmul.f32 %v1412_v37, %v1044_v3 }
 0x215   : > { %v1059_v42 = vadd.f32 %v1058_v4, %v1054_v38 }
 0x216   : > { %v1414_v32 = vpop.eup %1413  ;;  %v1068_v40 = vadd.f32 %v1067_v34, %v1055_v39 }
 0x217   : > { %v1416_v5 = vpop.eup %1415  ;;  %v1056_v44 = vmul.f32 %v1414_v32, %v1048_v15 }
 0x218   : > { %v1057_v27 = vmul.f32 %v1416_v5, %v1048_v15 }
 0x219   : > { %v1060_v35 = vadd.f32 %v1059_v42, %v1056_v44 }
 0x21a   : > { %v1069_v36 = vadd.f32 %v1068_v40, %v1057_v27 }
 0x21b   : > { %v1061_v57 = vrot.slane %v1060_v35, 4 }
 0x21c   : > { %v1070_v8 = vrot.slane %v1069_v36, 4 }
 0x21d   : > { %v1062_v25 = vadd.f32 %v1061_v57, %v1060_v35 }
 0x21e   : > { %v1071_v30 = vadd.f32 %v1070_v8, %v1069_v36 }
 0x21f   : > { %v1063_v31 = vrot.slane %v1062_v25, 2 }
 0x220   : > { %v1072_v41 = vrot.slane %v1071_v30, 2 }
 0x221   : > { %v1064_v43 = vadd.f32 %v1063_v31, %v1062_v25 }
 0x222   : > { %v1073_v46 = vadd.f32 %v1072_v41, %v1071_v30 }
 0x223   : > { %v1065_v29 = vrot.slane %v1064_v43, 1 }
 0x224   : > { %v1074_v47 = vrot.slane %v1073_v46, 1 }
 0x225   : > { %v1066_v49 = vadd.f32 %v1065_v29, %v1064_v43 }
 0x226   : > { %v1075_v7 = vadd.f32 %v1074_v47, %v1073_v46 }
 0x228   : > { %v1078_v51 = vcombine.low %v1066_v49, %v1075_v7 }
 0x22a   : > { %v1085_v52 = vrot.slane %v1078_v51, %v1084_v50 }
 0x22c   : > { %v1092_v48 = vrot.slane %v1085_v52, %v1084_v50 }
 0x22e   : > { %1098 = vst.msk [vmem:[%s174_s27] sm:$0x3] %vm1096_vm1, %v1092_v48 }
 0x22f   : > { %1488 = shalt.err (!%p1485_p7)
}
 0x230   : > { %s1489_s7 = scalar_lea.hbm %s1914_s30, 32  ;;  %s1493_s25 = scalar_lea.hbm %s1960_s2, 64 }
 0x231   : > { %p1490_p9 = scmp.ne.s32.totalorder %s1914_s30, %s1489_s7  ;;  %p1494_p0 = scmp.lt.u32.totalorder %s1914_s30, %s1960_s2 }
 0x232   : > { %p1495_p11 = scmp.lt.u32.totalorder %s1493_s25, %s1489_s7  ;;  %p1497_p4 = scmp.lt.u32.totalorder %s1489_s7, %s1914_s30 }
 0x233   : > { %p1491_p2 = pnand %p1490_p9, %p1665_p12 }
 0x234   : > { %p1496_p1 = por %p1495_p11, %p1494_p0 }
 0x235   : > { %p1492_p5 = pneg %p1491_p2 }
 0x236   : > { %p1498_p6 = por %p1497_p4, %p1496_p1 }
 0x238   : > { %p1499_p8 = pnand %p1498_p6, %p1492_p5 }
 0x23a   : > { %1502 = shalt.err (!%p1499_p8)
}
 0x23b   : > { %1314 = dma.vmem_to_hbm [thread:$0]  (%p1665_p12), %s1916_s22, 32, %s1914_s30, %s1100_s3  }
 0x23c PF: > { %s1126_s19 = sand.u32 1, %s1533_s9   ;;  %p1975_p10 = scmp.ne.s32.totalorder %s1965_s16, 0 }
 0x23d   : > { %p1976_p13 = scmp.ge.s32.totalorder %s1545_s12, 2  ;;  %s1127_s29 = scalar_lea.sflag [#allocation4], %s1126_s19 }
 0x23f   : > { %p1325_p3 = pnand %p1976_p13, %p1975_p10 }
 0x241   : > { %1528 = dma.done.wait (!%p1325_p3), %s1127_s29, 32  }
 0x242   : > { %1530 = vsyncadd (!%p1325_p3), %s1127_s29, 4294967264  ;;  %p16_p7 = scmp.ge.s32.totalorder %s1630_s21, 4   ;;  %s1977_s9 = smov %s1537_s10 }
 0x243   : > { %s1978_s10 = smov %s1541_s11  ;;  %s1979_s11 = smov %s1661_s8 }
 0x244   : > { %s1980_s12 = smov %s1630_s21  ;;  %18 = sbr.rel (!%p16_p7) target bundleno = 6 (0x6), region = 77 }
 0x24b   :  { %1132 = vsyncpa [#allocation3], 1 }
 0x24c   :  { %1134 = vsyncpa [#allocation3 + $0x1], 1 }
 0x24d   :  { %1135 = vsyncpa [#allocation6], 1 }
 0x24e   :  { %1136 = vsyncpa [#allocation4], 1 }
 0x24f   :  { %1138 = vsyncpa [#allocation4 + $0x1], 1 }

</bundles_post_ra>
